<compile_context>
chip_gen: v5e
topology: v5e:2x2
jax: 0.10.0
libtpu: 0.0.40
codegen_flags: <defaults>
</compile_context>

<pallas_src>
import numpy as np
import jax
import jax.numpy as jnp
from jax import lax
from jax.experimental import pallas as pl
from jax.experimental.pallas import tpu as pltpu  # noqa: F401  (kept for TPU-specific tuning hooks)

# ---------------- problem sizes (small, consistent with the module) ---------
B, CIN, H, W = 2, 4, 16, 16        # input NCHW
CMID = 8                           # backbone feature channels
NCLS = 5                           # classifier output channels (num classes)
K = 3                              # backbone conv kernel size
STRIDE = 2
OH, OW = H // STRIDE, W // STRIDE  # backbone / classifier spatial size (8, 8)
KKC = CIN * K * K                  # 36 im2col taps, (cin, kh, kw) row order
COLS = B * OH * OW                 # 128 folded batch*spatial columns
OUT_COLS = B * H * W               # 512 folded batch*spatial output columns


# ---------------- bilinear-interp matrix (align_corners=False) --------------
def _interp_matrix(out_size: int, in_size: int) -> np.ndarray:
    """Row o holds the bilinear weights PyTorch F.interpolate(mode='bilinear',
    align_corners=False) uses along one axis."""
    scale = in_size / out_size
    dst = np.arange(out_size)
    src = (dst + 0.5) * scale - 0.5
    src = np.maximum(src, 0.0)                         # PyTorch clamps negatives
    i0 = np.minimum(np.floor(src).astype(np.int64), in_size - 1)
    i1 = np.minimum(i0 + 1, in_size - 1)
    frac = (src - i0).astype(np.float32)
    A = np.zeros((out_size, in_size), dtype=np.float32)
    A[dst, i0] += 1.0 - frac
    A[dst, i1] += frac
    return A


# ---------------- the fused Pallas kernel (no grid, single step) ------------
def seg_kernel(p_ref, wbT_ref, wcT_ref, mt_ref, feat_ref, out_ref):
    # p_ref   : (KKC+1, COLS)     bf16  transposed im2col patches, last row = ones
    # wbT_ref : (CMID+1, KKC+1)   bf16  backbone weights; bias folded into last
    #                                   column, last row = ReLU pass-through row
    # wcT_ref : (NCLS, CMID+1)    bf16  classifier weights; bias folded into last col
    # mt_ref  : (COLS, OUT_COLS)  bf16  block-diagonal bilinear upsample matrix
    # feat_ref: (CMID, COLS)      f32   backbone features (quant_out), lane-dense
    # out_ref : (NCLS, OUT_COLS)  f32   upsampled segmentation logits, lane-dense

    # backbone: conv3x3 s2 as matmul over im2col (transposed) + folded bias + ReLU
    featT = jnp.maximum(
        jnp.dot(wbT_ref[...], p_ref[...], preferred_element_type=jnp.float32), 0.0
    )                                                     # (CMID+1, 128); last row == 1
    feat_ref[...] = featT[:CMID, :]                       # single full-lane (8,128) store

    # classifier: 1x1 conv == matmul over channels, bias via the ones row
    logitsT = jnp.dot(wcT_ref[...], featT.astype(jnp.bfloat16),
                      preferred_element_type=jnp.float32)  # (NCLS, 128)

    # bilinear upsample for all batches at once via the block-diagonal matrix
    out_ref[...] = jnp.dot(logitsT.astype(jnp.bfloat16), mt_ref[...],
                           preferred_element_type=jnp.float32)  # (NCLS, 512)


def _build_pallas_fn():
    flops = 2 * ((CMID + 1) * (KKC + 1) * COLS
                 + NCLS * (CMID + 1) * COLS
                 + NCLS * COLS * OUT_COLS)
    bytes_accessed = ((KKC + 1) * COLS * 2 + (CMID + 1) * (KKC + 1) * 2
                      + NCLS * (CMID + 1) * 2 + COLS * OUT_COLS * 2
                      + CMID * COLS * 4 + NCLS * OUT_COLS * 4)
    return pl.pallas_call(
        seg_kernel,
        out_shape=(
            jax.ShapeDtypeStruct((CMID, COLS), jnp.float32),     # features^T
            jax.ShapeDtypeStruct((NCLS, OUT_COLS), jnp.float32),  # logits^T (upsampled)
        ),
        cost_estimate=pl.CostEstimate(flops=flops, transcendentals=0,
                                      bytes_accessed=bytes_accessed),
    )


_PALLAS_FN = _build_pallas_fn()


# ---------------- parameters (folded / augmented for the kernel) ------------
def init_params(key):
    k1, k2, k3, k4 = jax.random.split(key, 4)
    # PyTorch-style layouts: conv weight OIHW, 1x1 classifier weight (O, I)
    wb = jax.random.normal(k1, (CMID, CIN, K, K), jnp.float32) * (1.0 / np.sqrt(KKC))
    bb = jax.random.normal(k2, (CMID,), jnp.float32) * 0.01
    wc = jax.random.normal(k3, (NCLS, CMID), jnp.float32) * (1.0 / np.sqrt(CMID))
    bc = jax.random.normal(k4, (NCLS,), jnp.float32) * 0.01

    wb_flat = wb.reshape(CMID, KKC)                       # cols in (cin, kh, kw) order

    # Backbone weights with the bias folded via the ones-row of the patch matrix;
    # an extra output row (e_{KKC}) reproduces that ones-row through the ReLU so
    # the classifier bias can be folded the same way.
    wbT_full = jnp.zeros((CMID + 1, KKC + 1), jnp.float32)
    wbT_full = wbT_full.at[:CMID, :KKC].set(wb_flat)
    wbT_full = wbT_full.at[:CMID, KKC].set(bb)
    wbT_full = wbT_full.at[CMID, KKC].set(1.0)

    wcT_aug = jnp.concatenate([wc, bc.reshape(NCLS, 1)], axis=1)   # (NCLS, CMID+1)

    # Block-diagonal bilinear upsample matrix: one (OH*OW, H*W) block per batch.
    ah = _interp_matrix(H, OH)                            # (H, OH)
    aw = _interp_matrix(W, OW)                            # (W, OW)
    m = np.kron(ah, aw)                                   # (H*W, OH*OW)
    mt = m.T                                              # (OH*OW, H*W)
    mt_blk = np.zeros((COLS, OUT_COLS), dtype=np.float32)
    for b in range(B):
        mt_blk[b * OH * OW:(b + 1) * OH * OW, b * H * W:(b + 1) * H * W] = mt

    params = {
        "wbT": wbT_full.astype(jnp.bfloat16),
        "wcT": wcT_aug.astype(jnp.bfloat16),
        "mt_blk": jnp.asarray(mt_blk, jnp.bfloat16),       # interp weights are bf16-exact
    }
    # f32 copies kept only for the in-script numpy reference check
    ref = {"wb_flat": np.asarray(wb_flat), "bb": np.asarray(bb),
           "wc": np.asarray(wc), "bc": np.asarray(bc), "m": m}
    return params, ref


# ---------------- wrapper: NCHW in/out, im2col as one XLA patches op --------
def _im2col_T(x_nchw):
    """3x3 / stride-2 / pad-1 patches, transposed: (KKC+1, B*OH*OW) bf16.
    Row order = (cin, kh, kw); column order = (b, oh, ow); last row = ones."""
    patches = lax.conv_general_dilated_patches(
        x_nchw, filter_shape=(K, K), window_strides=(STRIDE, STRIDE),
        padding=((1, 1), (1, 1)))                          # (B, KKC, OH, OW), (cin,kh,kw) order
    t = patches.transpose(1, 0, 2, 3).reshape(KKC, COLS)   # (36, 128)
    t = jnp.concatenate([t, jnp.ones((1, COLS), t.dtype)], axis=0)
    return t.astype(jnp.bfloat16)


@jax.jit
def simple_segmentation_forward(x_nchw, params):
    # matches _SimpleSegmentationModel.forward with aux_classifier=None
    patchesT = _im2col_T(x_nchw.astype(jnp.float32))
    feat_flat, out_flat = _PALLAS_FN(patchesT, params["wbT"], params["wcT"],
                                     params["mt_blk"])
    # lane-dense kernel outputs -> NCHW (tiny: 4 KB + 20 KB reshapes/transposes)
    logits = out_flat.reshape(NCLS, B, H, W).transpose(1, 0, 2, 3)
    quant_out = feat_flat.reshape(CMID, B, OH, OW).transpose(1, 0, 2, 3)
    return {"out": logits}, quant_out


# ---------------- pure-numpy f32 reference (correctness check) --------------
def _reference_forward(x, ref):
    xn = np.asarray(x, np.float32)
    xp = np.pad(xn, ((0, 0), (0, 0), (1, 1), (1, 1)))
    cols = np.zeros((B, KKC, OH, OW), np.float32)
    idx = 0
    for c in range(CIN):                                   # (cin, kh, kw) order
        for kh in range(K):
            for kw in range(K):
                cols[:, idx] = xp[:, c, kh:kh + STRIDE * OH:STRIDE,
                                        kw:kw + STRIDE * OW:STRIDE]
                idx += 1
    t = cols.reshape(B, KKC, OH * OW)                                   # (B, 36, 64)
    feat = np.maximum(np.einsum("ok,bks->bos", ref["wb_flat"], t)
                      + ref["bb"][None, :, None], 0.0)                  # (B, CMID, 64)
    logits = np.einsum("nc,bcs->bns", ref["wc"], feat) + ref["bc"][None, :, None]
    out = np.einsum("ps,bns->bnp", ref["m"], logits).reshape(B, NCLS, H, W)
    quant = feat.reshape(B, CMID, OH, OW)
    return out, quant


if __name__ == "__main__":
    key = jax.random.PRNGKey(0)
    kx, kp = jax.random.split(key)
    x = jax.random.normal(kx, (B, CIN, H, W), jnp.float32)              # NCHW input
    params, ref_params = init_params(kp)

    result, quant_out = simple_segmentation_forward(x, params)
    jax.block_until_ready((result, quant_out))

    assert result["out"].shape == (B, NCLS, H, W)
    assert quant_out.shape == (B, CMID, OH, OW)
    assert bool(jnp.all(jnp.isfinite(result["out"]))) and bool(jnp.all(jnp.isfinite(quant_out)))

    ref_out, ref_quant = _reference_forward(x, ref_params)
    # bf16 matmul operands with f32 accumulation -> modest tolerance vs f32 reference
    assert np.allclose(np.asarray(result["out"]), ref_out, rtol=2e-2, atol=5e-2), \
        "segmentation logits mismatch vs reference"
    assert np.allclose(np.asarray(quant_out), ref_quant, rtol=2e-2, atol=5e-2), \
        "quant_out features mismatch vs reference"

    print("KERNEL_OK")
</pallas_src>

<mosaic_0001>
module attributes {stable_mosaic.version = 11 : i64} {
  func.func @seg_kernel(%arg0: memref<37x128xbf16, #tpu.memory_space<vmem>>, %arg1: memref<9x37xbf16, #tpu.memory_space<vmem>>, %arg2: memref<5x9xbf16, #tpu.memory_space<vmem>>, %arg3: memref<128x512xbf16, #tpu.memory_space<vmem>>, %arg4: memref<8x128xf32, #tpu.memory_space<vmem>>, %arg5: memref<5x512xf32, #tpu.memory_space<vmem>>) attributes {dimension_semantics = [], scalar_prefetch = 0 : i64, scratch_operands = 0 : i64, tpu.core_type = #tpu.core_type<tc>} {
    %c0 = arith.constant 0 : index
    %c0_0 = arith.constant 0 : index
    %0 = vector.load %arg1[%c0, %c0_0] : memref<9x37xbf16, #tpu.memory_space<vmem>>, vector<9x37xbf16>
    %c0_1 = arith.constant 0 : index
    %c0_2 = arith.constant 0 : index
    %1 = vector.load %arg0[%c0_1, %c0_2] : memref<37x128xbf16, #tpu.memory_space<vmem>>, vector<37x128xbf16>
    %cst = arith.constant dense<0.000000e+00> : vector<9x128xf32>
    %2 = tpu.matmul %0, %1, %cst {dimension_numbers = #tpu.dot_dimension_numbers<[1], [0], [0], [1], [0, 0, 1, 1], [], []>} : vector<9x37xbf16>, vector<37x128xbf16>, vector<9x128xf32> -> vector<9x128xf32>
    %cst_3 = arith.constant 0.000000e+00 : f32
    %3 = vector.broadcast %cst_3 : f32 to vector<9x128xf32>
    %4 = arith.maximumf %2, %3 : vector<9x128xf32>
    %5 = vector.extract_strided_slice %4 {offsets = [0, 0], sizes = [8, 128], strides = [1, 1]} : vector<9x128xf32> to vector<8x128xf32>
    %c0_4 = arith.constant 0 : index
    %c0_5 = arith.constant 0 : index
    %6 = vector.load %arg4[%c0_4, %c0_5] : memref<8x128xf32, #tpu.memory_space<vmem>>, vector<8x128xf32>
    tpu.vector_store %arg4[%c0_4, %c0_5], %5 {strides = array<i32>} : memref<8x128xf32, #tpu.memory_space<vmem>>, vector<8x128xf32>,
    %c0_6 = arith.constant 0 : index
    %c0_7 = arith.constant 0 : index
    %7 = vector.load %arg2[%c0_6, %c0_7] : memref<5x9xbf16, #tpu.memory_space<vmem>>, vector<5x9xbf16>
    %8 = arith.truncf %4 : vector<9x128xf32> to vector<9x128xbf16>
    %cst_8 = arith.constant dense<0.000000e+00> : vector<5x128xf32>
    %9 = tpu.matmul %7, %8, %cst_8 {dimension_numbers = #tpu.dot_dimension_numbers<[1], [0], [0], [1], [0, 0, 1, 1], [], []>} : vector<5x9xbf16>, vector<9x128xbf16>, vector<5x128xf32> -> vector<5x128xf32>
    %10 = arith.truncf %9 : vector<5x128xf32> to vector<5x128xbf16>
    %c0_9 = arith.constant 0 : index
    %c0_10 = arith.constant 0 : index
    %11 = vector.load %arg3[%c0_9, %c0_10] : memref<128x512xbf16, #tpu.memory_space<vmem>>, vector<128x512xbf16>
    %cst_11 = arith.constant dense<0.000000e+00> : vector<5x512xf32>
    %12 = tpu.matmul %10, %11, %cst_11 {dimension_numbers = #tpu.dot_dimension_numbers<[1], [0], [0], [1], [0, 0, 1, 1], [], []>} : vector<5x128xbf16>, vector<128x512xbf16>, vector<5x512xf32> -> vector<5x512xf32>
    %c0_12 = arith.constant 0 : index
    %c0_13 = arith.constant 0 : index
    %13 = vector.load %arg5[%c0_12, %c0_13] : memref<5x512xf32, #tpu.memory_space<vmem>>, vector<5x512xf32>
    tpu.vector_store %arg5[%c0_12, %c0_13], %12 {strides = array<i32>} : memref<5x512xf32, #tpu.memory_space<vmem>>, vector<5x512xf32>,
    return
  }
}

</mosaic_0001>

<bundles_post_ra>
// kernel: simple_segmentation_forward.1
= control target key start
LH: loop header
LB: loop body
LE: loop exit
PB: predicated region body
PF: predicated region fallthrough
CT: control target
= control target key end

     0   :  { %vm51_vm0 = vcmask 1041408   ;;  %vm52_vm1 = vcmask 1042432   ;;  %v536_v1 = vmov 65535   ;;  %vm47_vm2 = vcmask 302080   ;;  %s794_s0 = inlined_call_operand.vmem [shape: bf16[37,128], index: 0, kind: input, shape index: {}]   ;;  %s795_s1 = inlined_call_operand.vmem [shape: bf16[9,37], index: 1, kind: input, shape index: {}]   ;;  %s796_s3 = inlined_call_operand.vmem [shape: bf16[128,512], index: 3, kind: input, shape index: {}]   ;;  %s797_s4 = inlined_call_operand.vmem [shape: f32[8,128], index: 4, kind: output, shape index: {0}]   ;;  %s798_s2 = inlined_call_operand.vmem [shape: bf16[5,9], index: 2, kind: input, shape index: {}]   ;;  %s799_s5 = inlined_call_operand.vmem [shape: f32[5,512], index: 5, kind: output, shape index: {1}]  }
   0x1   :  { %v26_v0 = vld [vmem:[%s794_s0 + $0x10] sm:$0x7]  ;;  %v53_v2 = vsel %vm51_vm0, 4294967295, %v536_v1  ;;  %v502_v7 = vld [vmem:[%s794_s0 + $0x8] sm:$0xff]  ;;  %v501_v8 = vld [vmem:[%s794_s0] sm:$0xff]  ;;  %vm81_vm3 = vcmask 1043456  }
   0x2   :  { %v41_v3 = vunpack.c.l.b16 %v26_v0  ;;  %v54_v4 = vsel %vm52_vm1, %v53_v2, 0  ;;  %v360_v9 = vld [vmem:[%s795_s1] sm:$0xf]  ;;  %v500_v10 = vld [vmem:[%s795_s1] sm:$0x10]  ;;  %vm82_vm4 = vcmask 1044480  }
   0x3   :  { %v361_v11 = vor.u32 %v500_v10, %v360_v9  ;;  %v486_v12 = vld [vmem:[%s796_s3 + $0xe0] sm:$0xf]  ;;  %v533_v13 = vld [vmem:[%s796_s3 + $0xec] sm:$0xf0]  ;;  %v531_v14 = vld [vmem:[%s796_s3 + $0xe4] sm:$0xf] }
   0x4   :  { %v44_v5 = vpack.c.b16 %v41_v3, %v41_v3  ;;  %v487_v15 = vor.u32 %v533_v13, %v486_v12  ;;  %v488_v16 = vld [vmem:[%s796_s3 + $0xf0] sm:$0xf0]  ;;  %v532_v18 = vld [vmem:[%s796_s3 + $0xec] sm:$0xf]  ;;  %v496_v19 = vld [vmem:[%s796_s3 + $0xf8] sm:$0xf0] }
   0x5   :  { %v491_v17 = vor.u32 %v531_v14, %v488_v16  ;;  %v470_v20 = vld [vmem:[%s796_s3 + $0xc0] sm:$0xf]  ;;  %v499_v21 = vor.u32 %v532_v18, %v496_v19  ;;  %v529_v22 = vld [vmem:[%s796_s3 + $0xcc] sm:$0xf0]  ;;  %v527_v23 = vld [vmem:[%s796_s3 + $0xc4] sm:$0xf] }
   0x6   :  { %v56_v6 = vand.u32 %v54_v4, %v44_v5  ;;  %294 = vmatpush.bf16.msra.mxu2 %v487_v15  ;;  %v472_v24 = vld [vmem:[%s796_s3 + $0xd0] sm:$0xf0]  ;;  %v471_v25 = vor.u32 %v529_v22, %v470_v20  ;;  %v528_v27 = vld [vmem:[%s796_s3 + $0xcc] sm:$0xf]  ;;  %v480_v28 = vld [vmem:[%s796_s3 + $0xd8] sm:$0xf0] }
   0x7   :  { %307 = vmatpush.bf16.msra.mxu3 %v491_v17  ;;  %v475_v26 = vor.u32 %v527_v23, %v472_v24  ;;  %v454_v29 = vld [vmem:[%s796_s3 + $0xa0] sm:$0xf]  ;;  %v525_v30 = vld [vmem:[%s796_s3 + $0xac] sm:$0xf0]  ;;  %v483_v31 = vor.u32 %v528_v27, %v480_v28  ;;  %v523_v32 = vld [vmem:[%s796_s3 + $0xa4] sm:$0xf] }
   0x8   :  { %63 = vmatpush.bf16.msra.mxu0 %v56_v6  ;;  %v456_v33 = vld [vmem:[%s796_s3 + $0xb0] sm:$0xf0]  ;;  %v455_v34 = vor.u32 %v525_v30, %v454_v29  ;;  %v524_v35 = vld [vmem:[%s796_s3 + $0xac] sm:$0xf]  ;;  %v464_v36 = vld [vmem:[%s796_s3 + $0xb8] sm:$0xf0] }
   0x9   :  { %v459_v37 = vor.u32 %v523_v32, %v456_v33  ;;  %v438_v38 = vld [vmem:[%s796_s3 + $0x80] sm:$0xf]  ;;  %v521_v39 = vld [vmem:[%s796_s3 + $0x8c] sm:$0xf0]  ;;  %v467_v40 = vor.u32 %v524_v35, %v464_v36  ;;  %v519_v41 = vld [vmem:[%s796_s3 + $0x84] sm:$0xf] }
   0xa   :  { %295 = vmatpush.bf16.msra.mxu2 %v471_v25  ;;  %v440_v42 = vld [vmem:[%s796_s3 + $0x90] sm:$0xf0]  ;;  %v520_v43 = vld [vmem:[%s796_s3 + $0x8c] sm:$0xf]  ;;  %v448_v44 = vld [vmem:[%s796_s3 + $0x98] sm:$0xf0]  ;;  %v439_v45 = vor.u32 %v521_v39, %v438_v38 }
   0xb   :  { %308 = vmatpush.bf16.msra.mxu3 %v475_v26  ;;  %v443_v46 = vor.u32 %v519_v41, %v440_v42  ;;  %v422_v47 = vld [vmem:[%s796_s3 + $0x60] sm:$0xf]  ;;  %v517_v48 = vld [vmem:[%s796_s3 + $0x6c] sm:$0xf0]  ;;  %v451_v49 = vor.u32 %v520_v43, %v448_v44  ;;  %v515_v50 = vld [vmem:[%s796_s3 + $0x64] sm:$0xf] }
   0xc   :  { %64 = vmatpush.bf16.msra.mxu0 %v502_v7  ;;  %v424_v51 = vld [vmem:[%s796_s3 + $0x70] sm:$0xf0]  ;;  %v516_v53 = vld [vmem:[%s796_s3 + $0x6c] sm:$0xf]  ;;  %v432_v54 = vld [vmem:[%s796_s3 + $0x78] sm:$0xf0]  ;;  %v423_v56 = vor.u32 %v517_v48, %v422_v47 }
   0xd   :  { %v427_v57 = vor.u32 %v515_v50, %v424_v51  ;;  %v406_v58 = vld [vmem:[%s796_s3 + $0x40] sm:$0xf]  ;;  %v513_v59 = vld [vmem:[%s796_s3 + $0x4c] sm:$0xf0]  ;;  %v435_v60 = vor.u32 %v516_v53, %v432_v54  ;;  %v511_v61 = vld [vmem:[%s796_s3 + $0x44] sm:$0xf] }
   0xe   :  { %296 = vmatpush.bf16.msra.mxu2 %v455_v34  ;;  %v408_v62 = vld [vmem:[%s796_s3 + $0x50] sm:$0xf0]  ;;  %v512_v63 = vld [vmem:[%s796_s3 + $0x4c] sm:$0xf]  ;;  %v416_v0 = vld [vmem:[%s796_s3 + $0x58] sm:$0xf0]  ;;  %v407_v2 = vor.u32 %v513_v59, %v406_v58 }
   0xf   :  { %309 = vmatpush.bf16.msra.mxu3 %v459_v37  ;;  %v411_v3 = vor.u32 %v511_v61, %v408_v62  ;;  %v390_v4 = vld [vmem:[%s796_s3 + $0x20] sm:$0xf]  ;;  %v509_v5 = vld [vmem:[%s796_s3 + $0x2c] sm:$0xf0]  ;;  %v83_v6 = vsel %vm81_vm3, 4294967295, %v536_v1  ;;  %v419_v7 = vor.u32 %v512_v63, %v416_v0  ;;  %vm77_vm5 = vcmask 72704  }
  0x10   :  { %65 = vmatpush.bf16.msra.mxu0 %v501_v8  ;;  %v507_v8 = vld [vmem:[%s796_s3 + $0x24] sm:$0xf]  ;;  %v392_v9 = vld [vmem:[%s796_s3 + $0x30] sm:$0xf0]  ;;  %v400_v12 = vld [vmem:[%s796_s3 + $0x38] sm:$0xf0]  ;;  %v391_v15 = vor.u32 %v509_v5, %v390_v4 }
  0x11   :  { %v494_v13 = vld [vmem:[%s796_s3 + $0xe8] sm:$0xf]  ;;  %v534_v14 = vld [vmem:[%s796_s3 + $0xf4] sm:$0xf0]  ;;  %v84_v16 = vsel %vm82_vm4, %v83_v6, 0  ;;  %v395_v17 = vor.u32 %v507_v8, %v392_v9 }
  0x12   :  { %297 = vmatpush.bf16.msra.mxu2 %v439_v45  ;;  %v495_v20 = vor.u32 %v534_v14, %v494_v13  ;;  %v478_v22 = vld [vmem:[%s796_s3 + $0xc8] sm:$0xf]  ;;  %v530_v23 = vld [vmem:[%s796_s3 + $0xd4] sm:$0xf0]  ;;  %v75_v24 = vld [vmem:[%s798_s2] sm:$0x7] }
  0x13   :  { %370 = vmatmul.msk.bf16.vlgmr.msra.gmra.mxu0 %vm47_vm2, %v361_v11  ;;  %310 = vmatpush.bf16.msra.mxu3 %v443_v46  ;;  %v508_v11 = vld [vmem:[%s796_s3 + $0x2c] sm:$0xf]  ;;  %v479_v25 = vor.u32 %v530_v23, %v478_v22  ;;  %v462_v26 = vld [vmem:[%s796_s3 + $0xa8] sm:$0xf]  ;;  %v526_v27 = vld [vmem:[%s796_s3 + $0xb4] sm:$0xf0] }
  0x14   :  { %333 = vmatpush.bf16.msrb.mxu0 %v499_v21  ;;  %v403_v19 = vor.u32 %v508_v11, %v400_v12  ;;  %v463_v28 = vor.u32 %v526_v27, %v462_v26  ;;  %v446_v29 = vld [vmem:[%s796_s3 + $0x88] sm:$0xf]  ;;  %v522_v30 = vld [vmem:[%s796_s3 + $0x94] sm:$0xf0]  ;;  %v374_v41 = vld [vmem:[%s796_s3] sm:$0xf] }
  0x15   :  { %v430_v32 = vld [vmem:[%s796_s3 + $0x68] sm:$0xf]  ;;  %v518_v33 = vld [vmem:[%s796_s3 + $0x74] sm:$0xf0]  ;;  %v505_v42 = vld [vmem:[%s796_s3 + $0xc] sm:$0xf0] }
  0x16   :  { %298 = vmatpush.bf16.msra.mxu2 %v423_v56  ;;  %v431_v34 = vor.u32 %v518_v33, %v430_v32  ;;  %v414_v35 = vld [vmem:[%s796_s3 + $0x48] sm:$0xf]  ;;  %v514_v36 = vld [vmem:[%s796_s3 + $0x54] sm:$0xf0]  ;;  %v503_v43 = vld [vmem:[%s796_s3 + $0x4] sm:$0xf]  ;;  %v375_v44 = vor.u32 %v505_v42, %v374_v41 }
  0x17   :  { %311 = vmatpush.bf16.msra.mxu3 %v427_v57  ;;  %v415_v37 = vor.u32 %v514_v36, %v414_v35  ;;  %v398_v38 = vld [vmem:[%s796_s3 + $0x28] sm:$0xf]  ;;  %v510_v39 = vld [vmem:[%s796_s3 + $0x34] sm:$0xf0]  ;;  %v376_v45 = vld [vmem:[%s796_s3 + $0x10] sm:$0xf0] }
  0x18   :  { %334 = vmatpush.bf16.msrb.mxu0 %v483_v31  ;;  %v447_v31 = vor.u32 %v522_v30, %v446_v29  ;;  %v382_v46 = vld [vmem:[%s796_s3 + $0x8] sm:$0xf]  ;;  %v506_v47 = vld [vmem:[%s796_s3 + $0x14] sm:$0xf0]  ;;  %v379_v48 = vor.u32 %v503_v43, %v376_v45  ;;  %v504_v50 = vld [vmem:[%s796_s3 + $0xc] sm:$0xf] }
  0x19   :  { %v384_v51 = vld [vmem:[%s796_s3 + $0x18] sm:$0xf0] }
  0x1a   :  { %299 = vmatpush.bf16.msra.mxu2 %v407_v2 }
  0x1b   :  { %312 = vmatpush.bf16.msra.mxu3 %v411_v3 }
  0x1c   :  { %335 = vmatpush.bf16.msrb.mxu0 %v467_v40  ;;  %v399_v40 = vor.u32 %v510_v39, %v398_v38 }
  0x1e   :  { %300 = vmatpush.bf16.msra.mxu2 %v391_v15 }
  0x1f   :  { %313 = vmatpush.bf16.msra.mxu3 %v395_v17 }
  0x20   :  { %336 = vmatpush.bf16.msrb.mxu0 %v451_v49  ;;  %v383_v49 = vor.u32 %v506_v47, %v382_v46 }
  0x22   :  { %301 = vmatpush.bf16.msra.mxu2 %v375_v44 }
  0x23   :  { %314 = vmatpush.bf16.msra.mxu3 %v379_v48 }
  0x24   :  { %337 = vmatpush.bf16.msrb.mxu0 %v435_v60 }
  0x28   :  { %338 = vmatpush.bf16.msrb.mxu0 %v419_v7 }
  0x2c   :  { %339 = vmatpush.bf16.msrb.mxu0 %v403_v19 }
  0x90   :  { %v67_v52 = vpop.f32.mrf.mxu0 }
  0x91   :  { %v72_v55 = vmax.f32 %v67_v52, 0.0  ;;  %v387_v52 = vor.u32 %v504_v50, %v384_v51 }
  0x93   :  { %74 = vst [vmem:[%s797_s4] sm:$0xff] %v72_v55  ;;  %340 = vmatpush.bf16.msrb.mxu0 %v387_v52 }
  0x98   :  { %v69_v10 = vpop.f32.mrf.mxu0 }
  0x99   :  { %v73_v1 = vmax.f32 %v69_v10, 0.0 }
  0x9b   :  { %v76_v18 = vpack.c.bf16 %v73_v1, %v72_v55 }
  0x9d   :  { %v86_v21 = vand.u32 %v84_v16, %v76_v18 }
  0x9f   :  { %95 = vmatpush.bf16.msra.mxu1 %v86_v21 }
  0xa2   :  { %371 = vmatmul.msk.bf16.vlgmr.msra.gmra.mxu1 %vm77_vm5, %v75_v24 }
  0xa3   :  { %320 = vmatpush.bf16.msrb.mxu1 %v495_v20 }
  0xa7   :  { %321 = vmatpush.bf16.msrb.mxu1 %v479_v25 }
  0xab   :  { %322 = vmatpush.bf16.msrb.mxu1 %v463_v28 }
  0xaf   :  { %323 = vmatpush.bf16.msrb.mxu1 %v447_v31 }
  0xb3   :  { %324 = vmatpush.bf16.msrb.mxu1 %v431_v34 }
  0xb7   :  { %325 = vmatpush.bf16.msrb.mxu1 %v415_v37 }
  0xbb   :  { %326 = vmatpush.bf16.msrb.mxu1 %v399_v40 }
  0xbf   :  { %327 = vmatpush.bf16.msrb.mxu1 %v383_v49 }
 0x11f   :  { %v97_v53 = vpop.f32.mrf.mxu1 }
 0x120   :  { %v101_v54 = vpack.c.bf16 %v97_v53, %v97_v53 }
 0x122   :  { %302 = vmatmul.bf16.vlgmr.msra.gmra.mxu2 %v101_v54  ;;  %315 = vmatmul.bf16.vlgmr.msra.gmra.mxu3 %v101_v54 }
 0x123   :  { %328 = vmatmul.bf16.vlgmr.msrb.gmra.mxu1 %v101_v54  ;;  %341 = vmatmul.bf16.vlgmr.msrb.gmra.mxu0 %v101_v54 }
 0x127   :  { %v99_v55 = vpop.f32.mrf.mxu1 }
 0x1a0   :  { %v329_v56 = vpop.f32.mrf.mxu1  ;;  %v342_v57 = vpop.f32.mrf.mxu0 }
 0x1a1   :  { %348 = vst [vmem:[%s799_s5 + $0x10] sm:$0x1f] %v329_v56 }
 0x1a2   :  { %349 = vst [vmem:[%s799_s5 + $0x18] sm:$0x1f] %v342_v57 }
 0x1a5   :  { %v303_v58 = vpop.f32.mrf.mxu2  ;;  %v316_v59 = vpop.f32.mrf.mxu3 }
 0x1a6   :  { %346 = vst [vmem:[%s799_s5] sm:$0x1f] %v303_v58 }
 0x1a7   :  { %347 = vst [vmem:[%s799_s5 + $0x8] sm:$0x1f] %v316_v59 }
 0x1a8   :  { %v331_v60 = vpop.f32.mrf.mxu1  ;;  %v344_v61 = vpop.f32.mrf.mxu0 }
 0x1ad   :  { %v305_v62 = vpop.f32.mrf.mxu2  ;;  %v318_v63 = vpop.f32.mrf.mxu3 }

</bundles_post_ra>
